<compile_context>
chip_gen: v7x
topology: tpu7x:2x2x1
jax: 0.10.0
libtpu: 0.0.40
codegen_flags: <defaults>
</compile_context>

<pallas_src>
import jax
import jax.numpy as jnp
from jax import lax
from jax.experimental import pallas as pl
from jax.experimental.pallas import tpu as pltpu

IN_DIM = 10
HID_DIM = 100
HID_PAD = 128          # hidden dim padded to a full lane group (zero pad, exact)
OUT_DIM = 250


def _round_up(n, m):
    return ((n + m - 1) // m) * m


def _choose_tile(B, cap=512):
    """Pick (batch_tile, row_chunk).

    - tile rows <= cap (>= 512-row tiles already hit ~85% of HBM roofline),
    - at least 2 grid steps when B >= 16 (>= 4 when B >= 64) so the parallel
      batch axis shards across v7x's two TensorCores and DMAs are pipelined,
    - tile is a multiple of the in-kernel row chunk (128, or the tile itself
      if the tile is smaller), and a multiple of 8 (sublane).
    """
    min_steps = 1
    if B >= 16:
        min_steps = 2
    if B >= 64:
        min_steps = 4
    steps = max(pl.cdiv(B, cap), min_steps)
    tb = pl.cdiv(B, steps)
    if tb > 128:
        tb = _round_up(tb, 128)
        chunk = 128
    else:
        tb = _round_up(tb, 8)
        chunk = tb
    return tb, chunk


def _make_kernel(tb, chunk):
    n_chunks = tb // chunk

    def kernel(x_ref, w1_ref, b1_ref, w2_ref, b2_ref, o_ref):
        def body(c, carry):
            start = pl.multiple_of(c * chunk, chunk)
            rows = pl.ds(start, chunk)

            # fc1 + relu (MXU matmul, f32 accumulate); pad hidden cols are 0.
            h = jnp.dot(x_ref[rows, :], w1_ref[...],
                        preferred_element_type=jnp.float32)
            h = jnp.maximum(h + b1_ref[...], 0.0)            # (chunk, 128)

            # fc2
            logits = jnp.dot(h, w2_ref[...],
                             preferred_element_type=jnp.float32)
            logits = logits + b2_ref[...]                    # (chunk, 250)

            # numerically stable softmax over the last axis (exact divide).
            m = jnp.max(logits, axis=-1, keepdims=True)
            e = jnp.exp(logits - m)
            s = jnp.sum(e, axis=-1, keepdims=True)
            o_ref[rows, :] = (e / s).astype(o_ref.dtype)
            return carry

        lax.fori_loop(0, n_chunks, body, 0, unroll=True)

    return kernel


def prepare_params(w1, b1, w2, b2):
    """One-time weight prep (call once, outside the forward pass).

    Pads the hidden dim 100 -> 128 with zeros (exact: relu(0)=0 contributes
    nothing to fc2) and reshapes biases to (1, D) rows.
    w1: (10, 100), b1: (100,) or (1, 100), w2: (100, 250), b2: (250,) or (1, 250),
    stored as (in, out), i.e. transposed vs. torch nn.Linear.
    """
    b1 = jnp.asarray(b1).reshape(1, HID_DIM)
    b2 = jnp.asarray(b2).reshape(1, OUT_DIM)
    w1p = jnp.pad(w1, ((0, 0), (0, HID_PAD - HID_DIM)))
    b1p = jnp.pad(b1, ((0, 0), (0, HID_PAD - HID_DIM)))
    w2p = jnp.pad(w2, ((0, HID_PAD - HID_DIM), (0, 0)))
    return w1p, b1p, w2p, b2


def image_classifier_forward(x, w1p, b1p, w2p, b2p, *, tb_cap=512,
                             out_dtype=jnp.float32):
    """x: (B, 10) f32 -> (B, 250) softmax probabilities.

    Takes params already padded by prepare_params:
      w1p: (10, 128), b1p: (1, 128), w2p: (128, 250), b2p: (1, 250).
    """
    B, in_dim = x.shape
    assert in_dim == IN_DIM
    assert w1p.shape == (IN_DIM, HID_PAD) and b1p.shape == (1, HID_PAD)
    assert w2p.shape == (HID_PAD, OUT_DIM) and b2p.shape == (1, OUT_DIM)

    tb, chunk = _choose_tile(B, tb_cap)
    grid = pl.cdiv(B, tb)   # ragged last block handled by Pallas masking

    out = pl.pallas_call(
        _make_kernel(tb, chunk),
        out_shape=jax.ShapeDtypeStruct((B, OUT_DIM), out_dtype),
        grid_spec=pltpu.PrefetchScalarGridSpec(
            num_scalar_prefetch=0,
            grid=(grid,),
            in_specs=[
                pl.BlockSpec((tb, IN_DIM), lambda i: (i, 0)),        # x: tiled
                pl.BlockSpec((IN_DIM, HID_PAD), lambda i: (0, 0)),   # w1: resident
                pl.BlockSpec((1, HID_PAD), lambda i: (0, 0)),        # b1: resident
                pl.BlockSpec((HID_PAD, OUT_DIM), lambda i: (0, 0)),  # w2: resident
                pl.BlockSpec((1, OUT_DIM), lambda i: (0, 0)),        # b2: resident
            ],
            out_specs=pl.BlockSpec((tb, OUT_DIM), lambda i: (i, 0)),
        ),
        compiler_params=pltpu.CompilerParams(
            dimension_semantics=("parallel",),   # shard batch tiles across TCs
        ),
    )(x, w1p, b1p, w2p, b2p)
    return out


def init_params(key):
    """Deterministic init matching nn.Linear shapes (uniform +/- 1/sqrt(fan_in))."""
    k1, k2, k3, k4 = jax.random.split(key, 4)
    lim1 = 1.0 / jnp.sqrt(IN_DIM)
    lim2 = 1.0 / jnp.sqrt(HID_DIM)
    # Stored as (in, out) so kernel computes x @ W + b (== torch x @ W.T + b).
    w1 = jax.random.uniform(k1, (IN_DIM, HID_DIM), jnp.float32, -lim1, lim1)
    b1 = jax.random.uniform(k2, (1, HID_DIM), jnp.float32, -lim1, lim1)
    w2 = jax.random.uniform(k3, (HID_DIM, OUT_DIM), jnp.float32, -lim2, lim2)
    b2 = jax.random.uniform(k4, (1, OUT_DIM), jnp.float32, -lim2, lim2)
    return w1, b1, w2, b2


if __name__ == "__main__":
    key = jax.random.PRNGKey(0)
    k_x, k_p = jax.random.split(key)

    B = 16  # small batch; gives a 2-step grid so the pipelined path is exercised
    x = jax.random.normal(k_x, (B, IN_DIM), jnp.float32)
    w1, b1, w2, b2 = init_params(k_p)
    w1p, b1p, w2p, b2p = prepare_params(w1, b1, w2, b2)  # one-time padding

    out = image_classifier_forward(x, w1p, b1p, w2p, b2p)
    out = jax.block_until_ready(out)

    # Reference (plain JAX) forward, identical semantics to the torch module.
    ref_h = jnp.maximum(x @ w1 + b1, 0.0)
    ref_logits = ref_h @ w2 + b2
    ref = jax.nn.softmax(ref_logits, axis=1)

    assert out.shape == (B, OUT_DIM)
    assert jnp.allclose(jnp.sum(out, axis=1), 1.0, atol=1e-5)
    assert jnp.allclose(out, ref, atol=1e-4)

    print("KERNEL_OK")
</pallas_src>

<mosaic_0001>
module attributes {stable_mosaic.version = 11 : i64} {
  func.func @kernel(%arg0: i32, %arg1: memref<8x10xf32, #tpu.memory_space<vmem>>, %arg2: memref<10x128xf32, #tpu.memory_space<vmem>>, %arg3: memref<1x128xf32, #tpu.memory_space<vmem>>, %arg4: memref<128x250xf32, #tpu.memory_space<vmem>>, %arg5: memref<1x250xf32, #tpu.memory_space<vmem>>, %arg6: memref<8x250xf32, #tpu.memory_space<vmem>>) attributes {dimension_semantics = [#tpu.dimension_semantics<parallel>], iteration_bounds = array<i64: 2>, scalar_prefetch = 0 : i64, scratch_operands = 0 : i64, tpu.core_type = #tpu.core_type<tc>, window_params = [{transform_indices = @transform_0, window_bounds = array<i64: 8, 10>}, {pipeline_mode = #tpu.pipeline_mode<synchronous>, transform_indices = @transform_1, window_bounds = array<i64: 10, 128>}, {pipeline_mode = #tpu.pipeline_mode<synchronous>, transform_indices = @transform_2, window_bounds = array<i64: 1, 128>}, {pipeline_mode = #tpu.pipeline_mode<synchronous>, transform_indices = @transform_3, window_bounds = array<i64: 128, 250>}, {pipeline_mode = #tpu.pipeline_mode<synchronous>, transform_indices = @transform_4, window_bounds = array<i64: 1, 250>}, {transform_indices = @transform_5, window_bounds = array<i64: 8, 250>}]} {
    %c0_i32 = arith.constant 0 : i32
    %c8_i32 = arith.constant 8 : i32
    %0 = arith.muli %c0_i32, %c8_i32 : i32
    %1 = tpu.assume_multiple %0, 8 : i32
    %2 = arith.index_cast %1 : i32 to index
    %c0 = arith.constant 0 : index
    %3 = vector.load %arg1[%2, %c0] : memref<8x10xf32, #tpu.memory_space<vmem>>, vector<8x10xf32>
    %c0_0 = arith.constant 0 : index
    %c0_1 = arith.constant 0 : index
    %4 = vector.load %arg2[%c0_0, %c0_1] : memref<10x128xf32, #tpu.memory_space<vmem>>, vector<10x128xf32>
    %cst = arith.constant dense<0.000000e+00> : vector<8x128xf32>
    %5 = tpu.matmul %3, %4, %cst {dimension_numbers = #tpu.dot_dimension_numbers<[1], [0], [0], [1], [0, 0, 1, 1], [], []>} : vector<8x10xf32>, vector<10x128xf32>, vector<8x128xf32> -> vector<8x128xf32>
    %c0_2 = arith.constant 0 : index
    %c0_3 = arith.constant 0 : index
    %6 = vector.load %arg3[%c0_2, %c0_3] : memref<1x128xf32, #tpu.memory_space<vmem>>, vector<1x128xf32>
    %7 = vector.broadcast %6 : vector<1x128xf32> to vector<8x128xf32>
    %8 = arith.addf %5, %7 : vector<8x128xf32>
    %cst_4 = arith.constant 0.000000e+00 : f32
    %9 = vector.broadcast %cst_4 : f32 to vector<8x128xf32>
    %10 = arith.maximumf %8, %9 : vector<8x128xf32>
    %c0_5 = arith.constant 0 : index
    %c0_6 = arith.constant 0 : index
    %11 = vector.load %arg4[%c0_5, %c0_6] : memref<128x250xf32, #tpu.memory_space<vmem>>, vector<128x250xf32>
    %cst_7 = arith.constant dense<0.000000e+00> : vector<8x250xf32>
    %12 = tpu.matmul %10, %11, %cst_7 {dimension_numbers = #tpu.dot_dimension_numbers<[1], [0], [0], [1], [0, 0, 1, 1], [], []>} : vector<8x128xf32>, vector<128x250xf32>, vector<8x250xf32> -> vector<8x250xf32>
    %c0_8 = arith.constant 0 : index
    %c0_9 = arith.constant 0 : index
    %13 = vector.load %arg5[%c0_8, %c0_9] : memref<1x250xf32, #tpu.memory_space<vmem>>, vector<1x250xf32>
    %14 = vector.broadcast %13 : vector<1x250xf32> to vector<8x250xf32>
    %15 = arith.addf %12, %14 : vector<8x250xf32>
    %cst_10 = arith.constant dense<0xFF800000> : vector<8xf32>
    %16 = vector.multi_reduction <maximumf>, %15, %cst_10 [1] : vector<8x250xf32> to vector<8xf32>
    %17 = vector.shape_cast %16 : vector<8xf32> to vector<8x1xf32>
    %18 = vector.broadcast %17 : vector<8x1xf32> to vector<8x250xf32>
    %19 = arith.subf %15, %18 : vector<8x250xf32>
    %20 = math.exp %19 : vector<8x250xf32>
    %cst_11 = arith.constant dense<0.000000e+00> : vector<8xf32>
    %21 = vector.multi_reduction <add>, %20, %cst_11 [1] : vector<8x250xf32> to vector<8xf32>
    %22 = vector.shape_cast %21 : vector<8xf32> to vector<8x1xf32>
    %23 = vector.broadcast %22 : vector<8x1xf32> to vector<8x250xf32>
    %24 = arith.divf %20, %23 : vector<8x250xf32>
    %25 = arith.index_cast %1 : i32 to index
    %c0_12 = arith.constant 0 : index
    %26 = vector.load %arg6[%25, %c0_12] : memref<8x250xf32, #tpu.memory_space<vmem>>, vector<8x250xf32>
    tpu.vector_store %arg6[%25, %c0_12], %24 {strides = array<i32>} : memref<8x250xf32, #tpu.memory_space<vmem>>, vector<8x250xf32>,
    %c1_i32 = arith.constant 1 : i32
    return
  }
  func.func @transform_0(%arg0: i32) -> (i32, i32) {
    %c0_i32 = arith.constant 0 : i32
    %c0_i32_0 = arith.constant 0 : i32
    return %arg0, %c0_i32 : i32, i32
  }
  func.func @transform_1(%arg0: i32) -> (i32, i32) {
    %c0_i32 = arith.constant 0 : i32
    %c0_i32_0 = arith.constant 0 : i32
    %c0_i32_1 = arith.constant 0 : i32
    return %c0_i32, %c0_i32_0 : i32, i32
  }
  func.func @transform_2(%arg0: i32) -> (i32, i32) {
    %c0_i32 = arith.constant 0 : i32
    %c0_i32_0 = arith.constant 0 : i32
    %c0_i32_1 = arith.constant 0 : i32
    return %c0_i32, %c0_i32_0 : i32, i32
  }
  func.func @transform_3(%arg0: i32) -> (i32, i32) {
    %c0_i32 = arith.constant 0 : i32
    %c0_i32_0 = arith.constant 0 : i32
    %c0_i32_1 = arith.constant 0 : i32
    return %c0_i32, %c0_i32_0 : i32, i32
  }
  func.func @transform_4(%arg0: i32) -> (i32, i32) {
    %c0_i32 = arith.constant 0 : i32
    %c0_i32_0 = arith.constant 0 : i32
    %c0_i32_1 = arith.constant 0 : i32
    return %c0_i32, %c0_i32_0 : i32, i32
  }
  func.func @transform_5(%arg0: i32) -> (i32, i32) {
    %c0_i32 = arith.constant 0 : i32
    %c0_i32_0 = arith.constant 0 : i32
    return %arg0, %c0_i32 : i32, i32
  }
}

</mosaic_0001>

<bundles_post_ra>
// kernel: tpu_custom_call.1
= control target key start
LH: loop header
LB: loop body
LE: loop exit
PB: predicated region body
PF: predicated region fallthrough
CT: control target
= control target key end

     0   :  { %10 = vsyncpa [#allocation3], 0  ;;  %s1187_s0 = inlined_call_operand.hbm [shape: f32[16,10], index: 0, kind: input, shape index: {}]   ;;  %s1188_s1 = inlined_call_operand.hbm [shape: f32[10,128], index: 1, kind: input, shape index: {}]   ;;  %s1189_s2 = inlined_call_operand.vmem [shape: f32[1,128], index: 2, kind: input, shape index: {}]   ;;  %s1190_s3 = inlined_call_operand.hbm [shape: f32[128,250], index: 3, kind: input, shape index: {}]   ;;  %s1191_s4 = inlined_call_operand.vmem [shape: f32[1,250], index: 4, kind: input, shape index: {}]   ;;  %s1192_s5 = inlined_call_operand.hbm [shape: f32[16,250], index: 5, kind: output, shape index: {}]  }
   0x1   :  { %12 = vsyncpa [#allocation3 + $0x1], 0 }
   0x2   :  { %13 = vsyncpa [#allocation6], 0 }
   0x3   :  { %14 = vsyncpa [#allocation4], 0 }
   0x4   :  { %16 = vsyncpa [#allocation4 + $0x1], 0  ;;  %s948_s18 = smov 0   ;;  %s950_s19 = smov 0  }
   0x5   :  { %s952_s20 = smov 0   ;;  %s954_s21 = smov 0  }
   0x6 LB: > { %s969_s22 = sadd.s32 4294967295, %s904_s21   ;;  %s600_s23 = sadd.s32 4294967294, %s904_s21   ;;  %s904_s21 = sphi %s954_s21, %s1212_s21   ;;  %s900_s20 = sphi %s952_s20, %s1211_s20   ;;  %s896_s19 = sphi %s950_s19, %s1210_s19   ;;  %s892_s18 = sphi %s948_s18, %s1209_s18  }
   0x7   : > { %p42_p0 = scmp.ne.s32.totalorder %s896_s19, %s892_s18  ;;  %p1193_p1 = scmp.eq.s32.totalorder %s969_s22, 0 }
   0x8   : > { %p156_p3 = scmp.eq.s32.totalorder %s600_s23, 1  ;;  %p601_p5 = scmp.ge.s32.totalorder %s904_s21, 1 }
   0x9   : > { %p978_p4 = por %p1193_p1, %p42_p0  ;;  %p163_p7 = scmp.lt.s32.totalorder %s904_s21, 3 }
   0xa   : > { %p983_p6 = por %p156_p3, %p42_p0  ;;  %s906_s27 = smov [#allocation5]  }
   0xb   : > { %s1196_s24 = scalar_select %p978_p4, 1, 0 }
   0xc   : > { %s1197_s25 = scalar_select %p983_p6, 1, 0 }
   0xd   : > { %p988_p8 = pnand %p601_p5, %p163_p7  ;;  %s175_s28 = sshll.u32 %s906_s27, 4  ;;  %s992_s28 = int_to_ptr.vmem [resolvable:$true] %s175_s28 }
   0xe   : > { %s907_s30 = smov [#allocation7]   ;;  %s748_s9 = scalar_lea.hbm %s1188_s1, 256 }
   0xf   : > { %p679_p9 = pneg %p988_p8  ;;  %s191_s6 = sshll.u32 %s907_s30, 4  ;;  %s1003_s6 = int_to_ptr.vmem [resolvable:$true] %s191_s6 }
  0x10   : > { %p749_p12 = scmp.ne.s32.totalorder %s1188_s1, %s748_s9  ;;  %p755_p5 = scmp.lt.u32.totalorder %s748_s9, %s1188_s1 }
  0x11   : > { %p999_p11 = pnand %p679_p9, %p1193_p1 }
  0x13   : > { %p750_p13 = pneg %p999_p11 }
  0x15   : > { %p751_p0 = pnand %p750_p13, %p749_p12 }
  0x17   : > { %p752_p3 = pneg %p751_p0 }
  0x19   : > { %p757_p7 = pnand %p755_p5, %p752_p3 }
  0x1b   : > { %760 = shalt.err (!%p757_p7)
}
  0x1c   : > { %s761_s14 = scalar_lea.vmem %s992_s28, 256  ;;  %p769_p2 = scmp.lt.s32.totalorder %s992_s28, %s992_s28 }
  0x1d   : > { %p762_p9 = scmp.ne.s32.totalorder %s992_s28, %s761_s14  ;;  %p770_p12 = scmp.lt.s32.totalorder %s761_s14, %s761_s14 }
  0x1f   : > { %p764_p10 = pnand %p762_p9, %p750_p13  ;;  %p771_p0 = por %p770_p12, %p769_p2 }
  0x21   : > { %p765_p1 = pneg %p764_p10 }
  0x23   : > { %p772_p6 = pnand %p771_p0, %p765_p1 }
  0x25   : > { %775 = shalt.err (!%p772_p6)
}
  0x26   : > { %s908_s15 = smov 128   ;;  %s909_s16 = smov 8  }
  0x27   : > { %682 = dma.hbm_to_vmem [thread:$0]  (!%p999_p11), %s1188_s1, 256, %s992_s28, [#allocation6], %s908_s15, %s908_s15, %s909_s16  }
  0x28   : > { %s776_s7 = scalar_lea.hbm %s1190_s3, 4096 }
  0x29   : > { %p777_p2 = scmp.ne.s32.totalorder %s1190_s3, %s776_s7  ;;  %p783_p10 = scmp.lt.u32.totalorder %s776_s7, %s1190_s3 }
  0x2b   : > { %p779_p1 = pnand %p777_p2, %p750_p13 }
  0x2d   : > { %p780_p6 = pneg %p779_p1 }
  0x2f   : > { %p785_p3 = pnand %p783_p10, %p780_p6 }
  0x31   : > { %788 = shalt.err (!%p785_p3)
}
  0x32   : > { %s789_s28 = scalar_lea.vmem %s1003_s6, 4096  ;;  %p797_p12 = scmp.lt.s32.totalorder %s1003_s6, %s1003_s6 }
  0x33   : > { %p790_p5 = scmp.ne.s32.totalorder %s1003_s6, %s789_s28  ;;  %p798_p0 = scmp.lt.s32.totalorder %s789_s28, %s789_s28 }
  0x35   : > { %p792_p7 = pnand %p790_p5, %p750_p13  ;;  %p799_p2 = por %p798_p0, %p797_p12 }
  0x37   : > { %p793_p9 = pneg %p792_p7 }
  0x39   : > { %p800_p1 = pnand %p799_p2, %p793_p9 }
  0x3b   : > { %803 = shalt.err (!%p800_p1)
}
  0x3c   : > { %s910_s12 = smov 256   ;;  %s911_s13 = smov 16  }
  0x3d   : > { %685 = dma.hbm_to_vmem [thread:$0]  (!%p999_p11), %s1190_s3, 4096, %s1003_s6, [#allocation6], %s910_s12, %s910_s12, %s911_s13  }
  0x3e   : > { %s1058_s16 = sadd.s32 1, %s904_s21   ;;  %s29_s23 = sadd.s32 1, %s900_s20 }
  0x3f   : > { %s26_s17 = ssub.s32 %s904_s21, %s1058_s16  ;;  %p36_p6 = scmp.ne.s32.totalorder %s900_s20, %s896_s19 }
  0x40   : > { %p27_p13 = scmp.eq.s32.totalorder %s26_s17, 0  ;;  %p37_p10 = scmp.eq.s32.totalorder %s904_s21, 0 }
  0x41   : > { %p1200_p5 = scmp.eq.s32.totalorder %s969_s22, 1  ;;  %p696_p9 = scmp.lt.s32.totalorder %s904_s21, 2 }
  0x42   : > { %s1067_s27 = scalar_select %p27_p13, %s900_s20, %s29_s23  }
  0x43   : > { %p38_p3 = por %p37_p10, %p36_p6  ;;  %p1071_p7 = por %p1200_p5, %p36_p6 }
  0x44   : > { %s208_s29 = sand.u32 1, %s900_s20   ;;  %s606_s6 = sshll.u32 %s904_s21, 7 }
  0x45   : > { %s1201_s30 = scalar_select %p1071_p7, 1, 0 }
  0x46   : > { %s605_s7 = sshll.u32 %s208_s29, 3  ;;  %s1081_s10 = scalar_lea.hbm %s1187_s0, %s606_s6 }
  0x47   : > { %s212_s11 = scalar_lea.vmem [#allocation2], %s605_s7  ;;  %p1085_p11 = pnand %p696_p9, %p38_p3 }
  0x48   : > { %s219_s28 = sshll.u32 %s212_s11, 4  ;;  %s209_s13 = scalar_lea.sflag [#allocation3], %s208_s29  ;;  %s1083_s28 = int_to_ptr.vmem [resolvable:$true] %s219_s28 }
  0x49   : > { %s804_s14 = scalar_lea.hbm %s1081_s10, 128  ;;  %p806_p0 = pneg %p1085_p11 }
  0x4a   : > { %p805_p12 = scmp.ne.s32.totalorder %s1081_s10, %s804_s14  ;;  %s809_s23 = scalar_lea.hbm %s1187_s0, 256 }
  0x4b   : > { %p810_p13 = scmp.lt.u32.totalorder %s1081_s10, %s1187_s0  ;;  %p811_p6 = scmp.lt.u32.totalorder %s809_s23, %s804_s14 }
  0x4c   : > { %p807_p2 = pnand %p806_p0, %p805_p12  ;;  %p813_p3 = scmp.lt.u32.totalorder %s804_s14, %s1081_s10 }
  0x4d   : > { %p812_p10 = por %p811_p6, %p810_p13 }
  0x4e   : > { %p808_p1 = pneg %p807_p2 }
  0x4f   : > { %p814_p5 = por %p813_p3, %p812_p10 }
  0x51   : > { %p815_p9 = pnand %p814_p5, %p808_p1 }
  0x53   : > { %818 = shalt.err (!%p815_p9)
}
  0x54   : > { %s819_s29 = scalar_lea.vmem %s1083_s28, 128  ;;  %s912_s8 = smov [#allocation2]  }
  0x55   : > { %p820_p12 = scmp.ne.s32.totalorder %s1083_s28, %s819_s29  ;;  %s824_s9 = sshll.u32 %s912_s8, 4  ;;  %s825_s9 = int_to_ptr.vmem [resolvable:$false] %s824_s9 }
  0x56   : > { %s826_s11 = scalar_lea.vmem %s825_s9, 256  ;;  %p827_p4 = scmp.lt.s32.totalorder %s1083_s28, %s825_s9 }
  0x57   : > { %p822_p2 = pnand %p820_p12, %p806_p0  ;;  %p828_p13 = scmp.lt.s32.totalorder %s826_s11, %s819_s29 }
  0x59   : > { %p823_p7 = pneg %p822_p2  ;;  %p829_p6 = por %p828_p13, %p827_p4 }
  0x5b   : > { %p830_p10 = pnand %p829_p6, %p823_p7 }
  0x5d   : > { %833 = shalt.err (!%p830_p10)
}
  0x5e   : > { %689 = dma.hbm_to_vmem [thread:$0]  (!%p1085_p11), %s1081_s10, 128, %s1083_s28, %s209_s13  }
  0x5f   : > { %228 = sbr.rel (%p988_p8) target bundleno = 877 (0x36d), region = 40  ;;  %s1117_s14 = sand.u32 (!%p988_p8), 1, %s896_s19  }
  0x60   : > { %s608_s15 = sshll.u32 (!%p988_p8), %s1117_s14, 3  ;;  %s231_s17 = scalar_lea.sflag (!%p988_p8), [#allocation3], %s1117_s14 }
  0x61   : > { %s234_s23 = scalar_lea.vmem (!%p988_p8), [#allocation2], %s608_s15  ;;  %p1203_p4 = scmp.ne.s32.totalorder (!%p988_p8), %s1196_s24, 0 }
  0x66   : > { %879 = dma.done.wait (%p1203_p4), %s231_s17, 128  }
  0x67   : > { %881 = vsyncadd (%p1203_p4), %s231_s17, 4294967168  ;;  %p1204_p7 = scmp.eq.s32.totalorder %s969_s22, 0 }
  0x69   : > { %883 = dma.done.wait (%p1204_p7), [#allocation6], 4352   ;;  %p1205_p11 = pmov %p1204_p7 }
  0x6a   : > { %v913_v0 = vmov 0.0|0.0   ;;  %vm914_vm0 = vmmov 0   ;;  %v915_v1 = vmov 0.0   ;;  %vm283_vm1 = vcmask 1041408   ;;  %v270_v2 = vld [vmem:[#allocation5] sm:$0xff]  ;;  %v269_v5 = vld [vmem:[%s234_s23] sm:$0xff] }
  0x6b   : > { %885 = vsyncadd (%p1205_p11), [#allocation6], 4294962944  ;;  %631 = vmatprep.subr.bf16.mxu0 %v913_v0  ;;  %628 = vmatprep.mubr.msk.f32.mxu0 %vm914_vm0, %v915_v1  ;;  %v271_v3 = vld [vmem:[#allocation5 + $0x8] sm:$0x3]  ;;  %vm916_vm2 = vmmov 1   ;;  %v359_v6 = vld [vmem:[#allocation7 + $0x8] sm:$0xff]  ;;  %v392_v59 = vlaneseq }
  0x6c   : > { %466 = vmatprep.mubr.f32.mxu1 %v915_v1  ;;  %vm633_vm3 = vmpackc.low %vm283_vm1, %vm916_vm2  ;;  %v632_v4 = vpack.c.bf16 %v271_v3, %v270_v2  ;;  %v361_v7 = vld [vmem:[#allocation7 + $0x18] sm:$0xff]  ;;  %v358_v8 = vld [vmem:[#allocation7] sm:$0xff]  ;;  %vm279_vm4 = vcmask 80896   ;;  %vm473_vm5 = vcmask 998400   ;;  %s611_s12 = sshll.u32 %s1117_s14, 4  ;;  %s620_s13 = sshll.u32 %s969_s22, 8 }
  0x6d   : > { %v635_v9 = vpack.c.bf16 %v361_v7, %v359_v6  ;;  %v360_v10 = vld [vmem:[#allocation7 + $0x10] sm:$0xff]  ;;  %v363_v11 = vld [vmem:[#allocation7 + $0x28] sm:$0xff]  ;;  %v365_v12 = vld [vmem:[#allocation7 + $0x38] sm:$0xff]  ;;  %v393_v60 = vshrl.u32 %v392_v59, 7  ;;  %s268_s7 = scalar_lea.vmem [#allocation8], %s611_s12  ;;  %s1142_s9 = scalar_lea.hbm %s1192_s5, %s620_s13 }
  0x6e   : > { %634 = vmatpush3.bf16.msk.msra.mxu0 %vm633_vm3, %v632_v4  ;;  %v637_v13 = vpack.c.bf16 %v360_v10, %v358_v8  ;;  %v639_v14 = vpack.c.bf16 %v365_v12, %v363_v11  ;;  %v362_v15 = vld [vmem:[#allocation7 + $0x20] sm:$0xff]  ;;  %v364_v16 = vld [vmem:[#allocation7 + $0x30] sm:$0xff]  ;;  %v367_v17 = vld [vmem:[#allocation7 + $0x48] sm:$0xff]  ;;  %s511_s6 = sshll.u32 %s268_s7, 4  ;;  %s497_s11 = scalar_lea.sflag [#allocation4], %s1117_s14  ;;  %s1144_s6 = int_to_ptr.vmem [resolvable:$true] %s511_s6 }
  0x6f   : > { %636 = vmatprep.subr.bf16.mxu1 %v635_v9  ;;  %v369_v18 = vld [vmem:[#allocation7 + $0x58] sm:$0xff]  ;;  %v641_v19 = vpack.c.bf16 %v364_v16, %v362_v15  ;;  %v366_v21 = vld [vmem:[#allocation7 + $0x40] sm:$0xff]  ;;  %v368_v22 = vld [vmem:[#allocation7 + $0x50] sm:$0xff]  ;;  %v398_v61 = vsub.s32 1, %v393_v60  ;;  %v394_v63 = vsub.s32 0, %v393_v60  ;;  %s834_s22 = scalar_lea.vmem %s1144_s6, 256 }
  0x70   : > { %638 = vmatpush1.bf16.msra.mxu1 %v637_v13  ;;  %v643_v20 = vpack.c.bf16 %v369_v18, %v367_v17  ;;  %v371_v23 = vld [vmem:[#allocation7 + $0x68] sm:$0xff]  ;;  %v373_v24 = vld [vmem:[#allocation7 + $0x78] sm:$0xff]  ;;  %v645_v25 = vpack.c.bf16 %v368_v22, %v366_v21  ;;  %v370_v27 = vld [vmem:[#allocation7 + $0x60] sm:$0xff]  ;;  %p835_p8 = scmp.ne.s32.totalorder %s1144_s6, %s834_s22  ;;  %p1206_p0 = scmp.ne.s32.totalorder %s1201_s30, 0 }
  0x71   : > { %629 = vmatmul.mubr.msk.f32.vlgmr.msra.gmra.mrb[0].mxu0 %vm279_vm4, %v269_v5  ;;  %640 = vmatprep.subr.bf16.mxu1 %v639_v14  ;;  %v647_v26 = vpack.c.bf16 %v373_v24, %v371_v23  ;;  %v372_v28 = vld [vmem:[#allocation7 + $0x70] sm:$0xff]  ;;  %v375_v29 = vld [vmem:[#allocation7 + $0x88] sm:$0xff]  ;;  %v377_v30 = vld [vmem:[#allocation7 + $0x98] sm:$0xff]  ;;  %s917_s15 = smov [#allocation8]  }
  0x72   : > { %v649_v31 = vpack.c.bf16 %v372_v28, %v370_v27  ;;  %v651_v32 = vpack.c.bf16 %v377_v30, %v375_v29  ;;  %v374_v33 = vld [vmem:[#allocation7 + $0x80] sm:$0xff]  ;;  %v376_v34 = vld [vmem:[#allocation7 + $0x90] sm:$0xff]  ;;  %v379_v35 = vld [vmem:[#allocation7 + $0xa8] sm:$0xff]  ;;  %p836_p1 = pnand %p835_p8, %p1206_p0  ;;  %s838_s17 = sshll.u32 %s917_s15, 4  ;;  %s839_s17 = int_to_ptr.vmem [resolvable:$false] %s838_s17 }
  0x73   : > { %v381_v36 = vld [vmem:[#allocation7 + $0xb8] sm:$0xff]  ;;  %v653_v37 = vpack.c.bf16 %v376_v34, %v374_v33  ;;  %v378_v39 = vld [vmem:[#allocation7 + $0xa0] sm:$0xff]  ;;  %v380_v40 = vld [vmem:[#allocation7 + $0xb0] sm:$0xff]  ;;  %s840_s23 = scalar_lea.vmem %s839_s17, 512  ;;  %p841_p5 = scmp.lt.s32.totalorder %s1144_s6, %s839_s17 }
  0x74   : > { %642 = vmatpush1.bf16.msra.mxu1 %v641_v19  ;;  %v655_v38 = vpack.c.bf16 %v381_v36, %v379_v35  ;;  %v383_v41 = vld [vmem:[#allocation7 + $0xc8] sm:$0xff]  ;;  %v385_v42 = vld [vmem:[#allocation7 + $0xd8] sm:$0xff]  ;;  %v657_v43 = vpack.c.bf16 %v380_v40, %v378_v39  ;;  %v382_v45 = vld [vmem:[#allocation7 + $0xc0] sm:$0xff]  ;;  %p837_p3 = pneg %p836_p1  ;;  %p842_p9 = scmp.lt.s32.totalorder %s840_s23, %s834_s22 }
  0x75   : > { %644 = vmatprep.subr.bf16.mxu1 %v643_v20  ;;  %v659_v44 = vpack.c.bf16 %v385_v42, %v383_v41  ;;  %v384_v46 = vld [vmem:[#allocation7 + $0xd0] sm:$0xff]  ;;  %v387_v48 = vld [vmem:[#allocation7 + $0xe8] sm:$0xff]  ;;  %v389_v49 = vld [vmem:[#allocation7 + $0xf8] sm:$0xff] }
  0x76   : > { %v661_v47 = vpack.c.bf16 %v384_v46, %v382_v45  ;;  %v663_v50 = vpack.c.bf16 %v389_v49, %v387_v48  ;;  %v386_v51 = vld [vmem:[#allocation7 + $0xe0] sm:$0xff]  ;;  %v388_v52 = vld [vmem:[#allocation7 + $0xf0] sm:$0xff]  ;;  %p843_p12 = por %p842_p9, %p841_p5 }
  0x77   : > { %v665_v53 = vpack.c.bf16 %v388_v52, %v386_v51  ;;  %v612_v54 = vld [vmem:[%s1189_s2] ss:$0 sm:$0xff] }
  0x78   : > { %646 = vmatpush1.bf16.msra.mxu1 %v645_v25  ;;  %v390_v62 = vld [vmem:[%s1191_s4] sm:$0x3]  ;;  %p844_p2 = pnand %p843_p12, %p837_p3 }
  0x79   : > { %648 = vmatprep.subr.bf16.mxu1 %v647_v26  ;;  %v399_v0 = vrot.slane %v390_v62, %v398_v61  ;;  %v395_v1 = vrot.slane %v390_v62, %v394_v63 }
  0x7c   : > { %650 = vmatpush1.bf16.msra.mxu1 %v649_v31 }
  0x7d   : > { %652 = vmatprep.subr.bf16.mxu1 %v651_v32 }
  0x80   : > { %654 = vmatpush1.bf16.msra.mxu1 %v653_v37 }
  0x81   : > { %656 = vmatprep.subr.bf16.mxu1 %v655_v38 }
  0x84   : > { %658 = vmatpush1.bf16.msra.mxu1 %v657_v43 }
  0x85   : > { %660 = vmatprep.subr.bf16.mxu1 %v659_v44 }
  0x88   : > { %662 = vmatpush1.bf16.msra.mxu1 %v661_v47 }
  0x89   : > { %664 = vmatprep.subr.bf16.mxu1 %v663_v50 }
  0x8c   : > { %666 = vmatpush1.bf16.msra.mxu1 %v665_v53 }
 0x144   : > { %v353_v55 = vpop.f32.mrb[0].mxu0 }
 0x145   : > { %v354_v56 = vadd.f32 %v612_v54, %v353_v55  ;;  %v630_v57 = vpop.f32.mrb[1].mxu0 }
 0x147   : > { %v357_v58 = vmax.f32 %v354_v56, 0.0 }
 0x149   : > { %467 = vmatmul.mubr.f32.vlgmr.msra.gmra.mrb[0].mxu1 %v357_v58 }
 0x21c   : > { %v468_v2 = vpop.f32.mrb[0].mxu1 }
 0x21d   : > { %v470_v3 = vpop.f32.mrb[1].mxu1  ;;  %v469_v5 = vadd.f32 %v468_v2, %v395_v1 }
 0x21e   : > { %v471_v4 = vadd.f32 %v470_v3, %v399_v0 }
 0x220   : > { %v474_v6 = vsel %vm473_vm5, %v471_v4, -inf }
 0x221   : > { %v475_v7 = vmax.f32 %v469_v5, %v474_v6 }
 0x223   : > { %476 = vmax.xlane.f32.xlu0 %v475_v7 }
 0x2b0   : > { %v477_v8 = vpop.xlane.xlu0 %476 }
 0x2b1   : > { %v478_v9 = vsub.f32 %v469_v5, %v477_v8  ;;  %v479_v10 = vsub.f32 %v471_v4, %v477_v8 }
 0x2b3   : > { %v480_v11 = vmul.f32 1.442695, %v478_v9  ;;  %v482_v12 = vmul.f32 1.442695, %v479_v10 }
 0x2b5   : > { %742 = vpow2.f32 %v480_v11 }
 0x2b6   : > { %744 = vpow2.f32 %v482_v12 }
 0x2bf   : > { %v743_v13 = vpop.eup %742 }
 0x2c0   : > { %v745_v14 = vpop.eup %744 }
 0x2c1   : > { %v484_v15 = vsel %vm473_vm5, %v745_v14, 0.0 }
 0x2c2   : > { %v485_v16 = vadd.f32 %v743_v13, %v484_v15 }
 0x2c4   : > { %486 = vadd.xlane.f32.xlu0 %v485_v16 }
 0x351   : > { %v487_v17 = vpop.xlane.xlu0 %486 }
 0x352   : > { %746 = vrcp.f32 %v487_v17 }
 0x35c   : > { %v747_v18 = vpop.eup %746 }
 0x35d   : > { %v489_v19 = vmul.f32 %v747_v18, %v743_v13  ;;  %v490_v20 = vmul.f32 %v747_v18, %v745_v14 }
 0x35f   : > { %494 = vst [vmem:[%s268_s7] sm:$0xff] %v489_v19  ;;  %495 = vst.msk [vmem:[%s268_s7 + $0x8] sm:$0xff] %vm473_vm5, %v490_v20 }
 0x360   : > { %847 = shalt.err (!%p844_p2)
}
 0x361   : > { %s848_s14 = scalar_lea.hbm %s1142_s9, 256  ;;  %s852_s10 = scalar_lea.hbm %s1192_s5, 512 }
 0x362   : > { %p849_p13 = scmp.ne.s32.totalorder %s1142_s9, %s848_s14  ;;  %p853_p4 = scmp.lt.u32.totalorder %s1142_s9, %s1192_s5 }
 0x363   : > { %p854_p7 = scmp.lt.u32.totalorder %s852_s10, %s848_s14  ;;  %p856_p8 = scmp.lt.u32.totalorder %s848_s14, %s1142_s9 }
 0x364   : > { %p850_p6 = pnand %p849_p13, %p1206_p0 }
 0x365   : > { %p855_p11 = por %p854_p7, %p853_p4 }
 0x366   : > { %p851_p10 = pneg %p850_p6 }
 0x367   : > { %p857_p1 = por %p856_p8, %p855_p11 }
 0x369   : > { %p858_p3 = pnand %p857_p1, %p851_p10 }
 0x36b   : > { %861 = shalt.err (!%p858_p3)
}
 0x36c   : > { %677 = dma.vmem_to_hbm [thread:$0]  (%p1206_p0), %s1144_s6, 256, %s1142_s9, %s497_s11  }
 0x36d PF: > { %s523_s13 = sand.u32 1, %s892_s18   ;;  %p1207_p5 = scmp.ne.s32.totalorder %s1197_s25, 0 }
 0x36e   : > { %p1208_p9 = scmp.ge.s32.totalorder %s904_s21, 2  ;;  %s524_s7 = scalar_lea.sflag [#allocation4], %s523_s13 }
 0x370   : > { %p691_p12 = pnand %p1208_p9, %p1207_p5 }
 0x372   : > { %887 = dma.done.wait (!%p691_p12), %s524_s7, 256  }
 0x373   : > { %889 = vsyncadd (!%p691_p12), %s524_s7, 4294967040  ;;  %p19_p2 = scmp.ge.s32.totalorder %s1058_s16, 4   ;;  %s1209_s18 = smov %s896_s19 }
 0x374   : > { %s1210_s19 = smov %s900_s20  ;;  %s1211_s20 = smov %s1067_s27 }
 0x375   : > { %s1212_s21 = smov %s1058_s16  ;;  %21 = sbr.rel (!%p19_p2) target bundleno = 6 (0x6), region = 94 }
 0x37c   :  { %529 = vsyncpa [#allocation3], 1 }
 0x37d   :  { %531 = vsyncpa [#allocation3 + $0x1], 1 }
 0x37e   :  { %532 = vsyncpa [#allocation6], 1 }
 0x37f   :  { %533 = vsyncpa [#allocation4], 1 }
 0x380   :  { %535 = vsyncpa [#allocation4 + $0x1], 1 }

</bundles_post_ra>
